<compile_context>
chip_gen: v7x
topology: tpu7x:2x2x1
jax: 0.10.0
libtpu: 0.0.40
codegen_flags: <defaults>
</compile_context>

<pallas_src>
import functools
import math

import jax
import jax.numpy as jnp
from jax.experimental import pallas as pl
from jax.experimental.pallas import tpu as pltpu


# ----------------------------------------------------------------------------
# Module helpers
# ----------------------------------------------------------------------------

def eca_kernel_size(channel, b=1, gamma=2):
    """Same kernel-size formula as the PyTorch ECA module."""
    ks = int(abs((math.log(channel, 2) + b) / gamma))
    return ks if ks % 2 else ks + 1


def _largest_divisor_le(n, cap):
    cap = max(1, min(n, cap))
    for d in range(cap, 0, -1):
        if n % d == 0:
            return d
    return 1


def _pick_hw_tile(hw, c, itemsize, budget_bytes):
    """Largest multiple of 128 that divides hw and fits the per-tile budget."""
    best = None
    t = 128
    while t <= hw:
        if hw % t == 0 and c * t * itemsize <= budget_bytes:
            best = t
        t += 128
    return best


# ----------------------------------------------------------------------------
# Kernels
# ----------------------------------------------------------------------------

def _channel_conv_sigmoid(mean, w_ref, k, out_dtype):
    """1-D cross-correlation (zero pad, no bias) along the channel axis + sigmoid.

    `mean` has shape (..., C, 1); the channel axis is the second-to-last axis.
    Matches nn.Conv1d(1, 1, k, padding=(k-1)//2, bias=False).
    """
    r = (k - 1) // 2
    c_ax = mean.ndim - 2
    C = mean.shape[c_ax]
    pad_cfg = [(0, 0)] * mean.ndim
    pad_cfg[c_ax] = (r, r)
    mp = jnp.pad(mean, pad_cfg)                           # zero pad along C
    idx = [slice(None)] * mean.ndim
    idx[c_ax] = slice(0, C)
    conv = w_ref[0] * mp[tuple(idx)]
    for j in range(1, k):
        idx[c_ax] = slice(j, j + C)
        conv = conv + w_ref[j] * mp[tuple(idx)]
    return jax.nn.sigmoid(conv).astype(out_dtype)         # EUP


def _eca_fused_kernel(x_ref, w_ref, o_ref, *, k, inv_hw):
    """Single-pass path. x_ref: (Bt, C, HW) in VMEM; w_ref: (k,) in SMEM."""
    # Global average pool over HW with f32 accumulation (no resident f32 copy
    # of the tile; the cast fuses into the cross-lane reduce on the XLU).
    mean = jnp.sum(x_ref[...], axis=2, keepdims=True, dtype=jnp.float32) * inv_hw
    scale = _channel_conv_sigmoid(mean, w_ref, k, o_ref.dtype)     # (Bt, C, 1)
    # Second direct read of the VMEM tile; lane-dense store, no f32 temp.
    o_ref[...] = x_ref[...] * scale


def _eca_sum_kernel(x_ref, sum_ref):
    """Two-pass path, pass 1: accumulate channel sums over HW tiles."""
    @pl.when(pl.program_id(1) == 0)
    def _():
        sum_ref[...] = jnp.zeros_like(sum_ref)
    sum_ref[...] += jnp.sum(x_ref[...], axis=1, keepdims=True, dtype=jnp.float32)


def _eca_scale_kernel(sum_ref, w_ref, x_ref, o_ref, *, k, inv_hw):
    """Two-pass path, pass 2: conv+sigmoid on the (C,1) means, scale the tile."""
    mean = sum_ref[...] * inv_hw                                   # (C, 1) f32
    scale = _channel_conv_sigmoid(mean, w_ref, k, o_ref.dtype)     # (C, 1), tiny
    o_ref[...] = x_ref[...] * scale


# ----------------------------------------------------------------------------
# Wrappers
# ----------------------------------------------------------------------------

_SINGLE_PASS_MAX_BYTES = 6 << 20     # per-batch (C*HW) cap for the fused path (v7x-safe)
_BLOCK_TARGET_BYTES = 4 << 20        # target block size after batch folding
_HW_TILE_MAX_BYTES = 2 << 20         # per HW tile cap in the two-pass path


def _eca_single_pass(x, w, *, k, block_target_bytes):
    N, C, HW = x.shape
    itemsize = jnp.dtype(x.dtype).itemsize
    per_batch = C * HW * itemsize
    Bt = _largest_divisor_le(N, max(1, block_target_bytes // per_batch))
    block_bytes = Bt * per_batch
    vmem_limit = int(min(100 << 20, max(32 << 20, 4 * block_bytes + (8 << 20))))

    kern = functools.partial(_eca_fused_kernel, k=k, inv_hw=1.0 / float(HW))
    cost = pl.CostEstimate(
        flops=2 * N * C * HW + 2 * N * C * k,
        transcendentals=N * C,
        bytes_accessed=2 * N * C * HW * itemsize + k * 4,
    )
    return pl.pallas_call(
        kern,
        out_shape=jax.ShapeDtypeStruct((N, C, HW), x.dtype),
        grid_spec=pltpu.PrefetchScalarGridSpec(
            num_scalar_prefetch=0,
            grid=(N // Bt,),
            in_specs=[
                pl.BlockSpec((Bt, C, HW), lambda g: (g, 0, 0)),
                pl.BlockSpec(memory_space=pltpu.MemorySpace.SMEM),   # conv weights
            ],
            out_specs=pl.BlockSpec((Bt, C, HW), lambda g: (g, 0, 0)),
        ),
        compiler_params=pltpu.CompilerParams(
            dimension_semantics=("parallel",),
            vmem_limit_bytes=vmem_limit,
        ),
        cost_estimate=cost,
    )(x, w)


def _eca_two_pass(x, w, *, k, hw_t):
    N, C, HW = x.shape
    n_hw = HW // hw_t
    itemsize = jnp.dtype(x.dtype).itemsize
    tile_bytes = C * hw_t * itemsize
    vmem_limit = int(min(100 << 20, max(32 << 20, 6 * tile_bytes + (8 << 20))))

    # Pass 1: per-batch channel sums (HW axis is a reduction -> "arbitrary").
    sums = pl.pallas_call(
        _eca_sum_kernel,
        out_shape=jax.ShapeDtypeStruct((N, C, 1), jnp.float32),
        grid_spec=pltpu.PrefetchScalarGridSpec(
            num_scalar_prefetch=0,
            grid=(N, n_hw),
            in_specs=[pl.BlockSpec((None, C, hw_t), lambda b, h: (b, 0, h))],
            out_specs=pl.BlockSpec((None, C, 1), lambda b, h: (b, 0, 0)),
        ),
        compiler_params=pltpu.CompilerParams(
            dimension_semantics=("parallel", "arbitrary"),
            vmem_limit_bytes=vmem_limit,
        ),
        cost_estimate=pl.CostEstimate(
            flops=N * C * HW, transcendentals=0,
            bytes_accessed=N * C * HW * itemsize + N * C * 4,
        ),
    )(x)

    # Pass 2: re-read HW tiles and apply the scale (both axes parallel so the
    # second TensorCore on v7x is used even at batch 1).
    kern = functools.partial(_eca_scale_kernel, k=k, inv_hw=1.0 / float(HW))
    out = pl.pallas_call(
        kern,
        out_shape=jax.ShapeDtypeStruct((N, C, HW), x.dtype),
        grid_spec=pltpu.PrefetchScalarGridSpec(
            num_scalar_prefetch=0,
            grid=(N, n_hw),
            in_specs=[
                pl.BlockSpec((None, C, 1), lambda b, h: (b, 0, 0)),
                pl.BlockSpec(memory_space=pltpu.MemorySpace.SMEM),
                pl.BlockSpec((None, C, hw_t), lambda b, h: (b, 0, h)),
            ],
            out_specs=pl.BlockSpec((None, C, hw_t), lambda b, h: (b, 0, h)),
        ),
        compiler_params=pltpu.CompilerParams(
            dimension_semantics=("parallel", "parallel"),
            vmem_limit_bytes=vmem_limit,
        ),
        cost_estimate=pl.CostEstimate(
            flops=N * C * HW + 2 * N * C * k * n_hw,
            transcendentals=N * C * n_hw,
            bytes_accessed=2 * N * C * HW * itemsize + N * C * 4 + k * 4,
        ),
    )(sums, w, x)
    return out


def eca(x_nchw, w, *,
        single_pass_max_bytes=_SINGLE_PASS_MAX_BYTES,
        block_target_bytes=_BLOCK_TARGET_BYTES,
        hw_tile_max_bytes=_HW_TILE_MAX_BYTES):
    """x_nchw: (N, C, H, W); w: (k,) 1-D conv weights.  Returns (N, C, H, W)."""
    N, C, H, W = x_nchw.shape
    HW = H * W
    k = int(w.shape[0])
    assert k % 2 == 1, "ECA conv kernel size must be odd ('same' padding)"

    x = x_nchw.reshape(N, C, HW)          # merge contiguous spatial dims; no transpose
    itemsize = jnp.dtype(x.dtype).itemsize
    per_batch = C * HW * itemsize

    if per_batch <= single_pass_max_bytes:
        out = _eca_single_pass(x, w, k=k, block_target_bytes=block_target_bytes)
    else:
        hw_t = _pick_hw_tile(HW, C, itemsize, hw_tile_max_bytes)
        if hw_t is None:
            # HW not a multiple of 128: keep the fused path with a raised limit.
            out = _eca_single_pass(x, w, k=k, block_target_bytes=per_batch)
        else:
            out = _eca_two_pass(x, w, k=k, hw_t=hw_t)
    return out.reshape(N, C, H, W)


# ----------------------------------------------------------------------------
# Reference & test
# ----------------------------------------------------------------------------

def eca_reference(x, w):
    """Plain-JAX reference matching the PyTorch ECA semantics."""
    N, C, H, W = x.shape
    k = w.shape[0]
    r = (k - 1) // 2
    y = jnp.mean(x, axis=(2, 3))                              # (N, C)
    yp = jnp.pad(y, ((0, 0), (r, r)))                         # zero padding
    conv = jnp.zeros((N, C), jnp.float32)
    for j in range(k):
        conv = conv + w[j] * yp[:, j:j + C]
    s = jax.nn.sigmoid(conv)
    return x * s[:, :, None, None]


if __name__ == "__main__":
    key = jax.random.PRNGKey(0)
    kx, kw, kx2, kw2 = jax.random.split(key, 4)

    # --- Test 1: small shapes, fused single-pass path with batch folding. ---
    N, C, H, W = 2, 16, 16, 16                  # C=16 -> kernel_size = 3
    k = eca_kernel_size(C)
    x = jax.random.normal(kx, (N, C, H, W), jnp.float32)
    w = 0.5 * jax.random.normal(kw, (k,), jnp.float32)

    out = jax.block_until_ready(eca(x, w))
    ref = eca_reference(x, w)
    assert out.shape == (N, C, H, W), out.shape
    if not jnp.allclose(out, ref, rtol=1e-4, atol=1e-5):
        raise AssertionError("Pallas ECA (single-pass) mismatch vs reference")

    # --- Test 2: force the two-pass HW-tiled path (v7x VMEM fallback). ---
    N2, C2, H2, W2 = 2, 32, 32, 32              # C=32 -> kernel_size = 3
    k2 = eca_kernel_size(C2)
    x2 = jax.random.normal(kx2, (N2, C2, H2, W2), jnp.float32)
    w2 = 0.5 * jax.random.normal(kw2, (k2,), jnp.float32)

    out2 = jax.block_until_ready(
        eca(x2, w2,
            single_pass_max_bytes=0,                       # force two-pass path
            hw_tile_max_bytes=C2 * 256 * 4))               # hw tile = 256 -> 4 tiles
    ref2 = eca_reference(x2, w2)
    assert out2.shape == (N2, C2, H2, W2), out2.shape
    if not jnp.allclose(out2, ref2, rtol=1e-4, atol=1e-5):
        raise AssertionError("Pallas ECA (two-pass) mismatch vs reference")

    print("KERNEL_OK")
</pallas_src>

<mosaic_0001>
module attributes {stable_mosaic.version = 11 : i64} {
  func.func @_eca_fused_kernel(%arg0: i32, %arg1: memref<2x16x256xf32, #tpu.memory_space<vmem>>, %arg2: memref<3xf32, #tpu.memory_space<smem>>, %arg3: memref<2x16x256xf32, #tpu.memory_space<vmem>>) attributes {dimension_semantics = [#tpu.dimension_semantics<parallel>], iteration_bounds = array<i64: 1>, scalar_prefetch = 0 : i64, scratch_operands = 0 : i64, tpu.core_type = #tpu.core_type<tc>, window_params = [{transform_indices = @transform_0, window_bounds = array<i64: 2, 16, 256>}, {transform_indices = @transform_1, window_bounds = array<i64: 3>}, {transform_indices = @transform_2, window_bounds = array<i64: 2, 16, 256>}]} {
    %c0 = arith.constant 0 : index
    %c0_0 = arith.constant 0 : index
    %c0_1 = arith.constant 0 : index
    %0 = vector.load %arg1[%c0, %c0_0, %c0_1] : memref<2x16x256xf32, #tpu.memory_space<vmem>>, vector<2x16x256xf32>
    %cst = arith.constant dense<0.000000e+00> : vector<2x16xf32>
    %1 = vector.multi_reduction <add>, %0, %cst [2] : vector<2x16x256xf32> to vector<2x16xf32>
    %2 = vector.shape_cast %1 : vector<2x16xf32> to vector<2x16x1xf32>
    %cst_2 = arith.constant 3.906250e-03 : f32
    %3 = vector.broadcast %cst_2 : f32 to vector<2x16x1xf32>
    %4 = arith.mulf %2, %3 : vector<2x16x1xf32>
    %c0_i32 = arith.constant 0 : i32
    %5 = arith.sitofp %c0_i32 : i32 to f32
    %6 = vector.broadcast %5 : f32 to vector<2x1x1xf32>
    %7 = tpu.concatenate %6, %4 in 1 : vector<2x1x1xf32>, vector<2x16x1xf32> -> vector<2x17x1xf32>
    %8 = vector.broadcast %5 : f32 to vector<2x1x1xf32>
    %9 = tpu.concatenate %7, %8 in 1 : vector<2x17x1xf32>, vector<2x1x1xf32> -> vector<2x18x1xf32>
    %c0_3 = arith.constant 0 : index
    %10 = memref.load %arg2[%c0_3] : memref<3xf32, #tpu.memory_space<smem>>
    %11 = vector.extract_strided_slice %9 {offsets = [0, 0, 0], sizes = [2, 16, 1], strides = [1, 1, 1]} : vector<2x18x1xf32> to vector<2x16x1xf32>
    %12 = vector.broadcast %10 : f32 to vector<2x16x1xf32>
    %13 = arith.mulf %12, %11 : vector<2x16x1xf32>
    %c1 = arith.constant 1 : index
    %14 = memref.load %arg2[%c1] : memref<3xf32, #tpu.memory_space<smem>>
    %15 = vector.extract_strided_slice %9 {offsets = [0, 1, 0], sizes = [2, 16, 1], strides = [1, 1, 1]} : vector<2x18x1xf32> to vector<2x16x1xf32>
    %16 = vector.broadcast %14 : f32 to vector<2x16x1xf32>
    %17 = arith.mulf %16, %15 : vector<2x16x1xf32>
    %18 = arith.addf %13, %17 : vector<2x16x1xf32>
    %c2 = arith.constant 2 : index
    %19 = memref.load %arg2[%c2] : memref<3xf32, #tpu.memory_space<smem>>
    %20 = vector.extract_strided_slice %9 {offsets = [0, 2, 0], sizes = [2, 16, 1], strides = [1, 1, 1]} : vector<2x18x1xf32> to vector<2x16x1xf32>
    %21 = vector.broadcast %19 : f32 to vector<2x16x1xf32>
    %22 = arith.mulf %21, %20 : vector<2x16x1xf32>
    %23 = arith.addf %18, %22 : vector<2x16x1xf32>
    %24 = arith.negf %23 : vector<2x16x1xf32>
    %25 = math.exp %24 : vector<2x16x1xf32>
    %cst_4 = arith.constant 1.000000e+00 : f32
    %26 = vector.broadcast %cst_4 : f32 to vector<2x16x1xf32>
    %27 = arith.addf %26, %25 : vector<2x16x1xf32>
    %28 = arith.divf %26, %27 : vector<2x16x1xf32>
    %c0_5 = arith.constant 0 : index
    %c0_6 = arith.constant 0 : index
    %c0_7 = arith.constant 0 : index
    %29 = vector.load %arg1[%c0_5, %c0_6, %c0_7] : memref<2x16x256xf32, #tpu.memory_space<vmem>>, vector<2x16x256xf32>
    %30 = vector.broadcast %28 : vector<2x16x1xf32> to vector<2x16x256xf32>
    %31 = arith.mulf %29, %30 : vector<2x16x256xf32>
    %c0_8 = arith.constant 0 : index
    %c0_9 = arith.constant 0 : index
    %c0_10 = arith.constant 0 : index
    %32 = vector.load %arg3[%c0_8, %c0_9, %c0_10] : memref<2x16x256xf32, #tpu.memory_space<vmem>>, vector<2x16x256xf32>
    tpu.vector_store %arg3[%c0_8, %c0_9, %c0_10], %31 {strides = array<i32>} : memref<2x16x256xf32, #tpu.memory_space<vmem>>, vector<2x16x256xf32>,
    return
  }
  func.func @transform_0(%arg0: i32) -> (i32, i32, i32) {
    %c0_i32 = arith.constant 0 : i32
    %c0_i32_0 = arith.constant 0 : i32
    %c0_i32_1 = arith.constant 0 : i32
    return %arg0, %c0_i32, %c0_i32_0 : i32, i32, i32
  }
  func.func @transform_1(%arg0: i32) -> i32 {
    %c0_i32 = arith.constant 0 : i32
    %c0_i32_0 = arith.constant 0 : i32
    return %c0_i32 : i32
  }
  func.func @transform_2(%arg0: i32) -> (i32, i32, i32) {
    %c0_i32 = arith.constant 0 : i32
    %c0_i32_0 = arith.constant 0 : i32
    %c0_i32_1 = arith.constant 0 : i32
    return %arg0, %c0_i32, %c0_i32_0 : i32, i32, i32
  }
}

</mosaic_0001>

<bundles_post_ra>
// kernel: tpu_custom_call.1
= control target key start
LH: loop header
LB: loop body
LE: loop exit
PB: predicated region body
PF: predicated region fallthrough
CT: control target
= control target key end

     0   :  { %7 = vsyncpa [#allocation3], 0  ;;  %s426_s0 = inlined_call_operand.hbm [shape: f32[2,16,256], index: 0, kind: input, shape index: {}]   ;;  %s427_s1 = inlined_call_operand.vmem [shape: f32[3], index: 1, kind: input, shape index: {}]   ;;  %s428_s2 = inlined_call_operand.hbm [shape: f32[2,16,256], index: 2, kind: output, shape index: {}]  }
   0x1   :  { %8 = vsyncpa [#allocation5], 0 }
   0x2   :  { %9 = vsyncpa [#allocation4], 0  ;;  %s326_s9 = smov [#allocation2]   ;;  %s28_s13 = sshll.u32 %s427_s1, 4  ;;  %s29_s13 = int_to_ptr.vmem [resolvable:$true] %s28_s13 }
   0x3   :  { %s15_s10 = sshll.u32 %s326_s9, 4  ;;  %s264_s16 = scalar_lea.hbm %s426_s0, 1024  ;;  %s16_s10 = int_to_ptr.vmem [resolvable:$true] %s15_s10 }
   0x4   :  { %p265_p0 = scmp.ne.s32.totalorder %s426_s0, %s264_s16  ;;  %p268_p1 = scmp.lt.u32.totalorder %s264_s16, %s426_s0 }
   0x6   :  { %p270_p2 = pnand %p268_p1, %p265_p0 }
   0x8   :  { %273 = shalt.err (!%p270_p2)
}
   0x9   :  { %s274_s21 = scalar_lea.vmem %s16_s10, 1024  ;;  %p279_p4 = scmp.lt.s32.totalorder %s16_s10, %s16_s10 }
   0xa   :  { %p275_p3 = scmp.ne.s32.totalorder %s16_s10, %s274_s21  ;;  %p280_p5 = scmp.lt.s32.totalorder %s274_s21, %s274_s21 }
   0xc   :  { %p281_p6 = por %p280_p5, %p279_p4 }
   0xe   :  { %p282_p7 = pnand %p281_p6, %p275_p3 }
  0x10   :  { %285 = shalt.err (!%p282_p7)
}
  0x11   :  { %s327_s1 = smov 256   ;;  %s328_s22 = smov 16  }
  0x12   :  { %21 = dma.hbm_to_vmem [thread:$0]  %s426_s0, 1024, %s16_s10, [#allocation3], %s327_s1, %s327_s1, %s328_s22  }
  0x13   :  { %s286_s25 = scalar_lea.vmem %s29_s13, 16  ;;  %p291_p9 = scmp.lt.s32.totalorder %s29_s13, %s29_s13 }
  0x14   :  { %p287_p8 = scmp.ne.s32.totalorder %s29_s13, %s286_s25  ;;  %p292_p10 = scmp.lt.s32.totalorder %s286_s25, %s286_s25 }
  0x16   :  { %p293_p11 = por %p292_p10, %p291_p9 }
  0x18   :  { %p294_p12 = pnand %p293_p11, %p287_p8 }
  0x1a   :  { %297 = shalt.err (!%p294_p12)
}
  0x1b   :  { %s329_s26 = smov [#allocation6]  }
  0x1c   :  { %31 = dma.vmem_to_smem %s29_s13, 16, %s329_s26, [#allocation5]  }
  0x1d   :  { %320 = dma.done.wait [#allocation3], 1024  }
  0x1e   :  { %321 = vsyncadd [#allocation3], 4294966272 }
  0x1f   :  { %322 = dma.done.wait [#allocation5], 16  }
  0x20   :  { %323 = vsyncadd [#allocation5], 4294967280 }
  0x21   :  { %38 = sfence }
  0x22   :  { %v365_v0 = vld [vmem:[#allocation2 + $0x20] sm:$0xff]  ;;  %v367_v1 = vld [vmem:[#allocation2 + $0x28] sm:$0xff]  ;;  %v375_v5 = vld [vmem:[#allocation2 + $0x30] sm:$0xff]  ;;  %v330_v12 = vmov 0   ;;  %s234_s0 = sld [smem:[#allocation6 + $0x1]]  ;;  %s235_s27 = sld [smem:[#allocation6 + $0x2]] }
  0x23   :  { %v369_v2 = vld [vmem:[#allocation2] sm:$0xff]  ;;  %v53_v3 = vadd.f32 %v367_v1, %v365_v0  ;;  %v373_v4 = vld [vmem:[#allocation2 + $0x8] sm:$0xff]  ;;  %v377_v6 = vld [vmem:[#allocation2 + $0x38] sm:$0xff]  ;;  %247 = vset.pattern.permute.xlu1 %v330_v12  ;;  %246 = vset.pattern.permute.xlu0 %v330_v12  ;;  %s84_s28 = sld [smem:[#allocation6]]  ;;  %vm67_vm0 = vcmask 1040384   ;;  %vm104_vm1 = vcmask 1046528  }
  0x24   :  { %v47_v7 = vadd.f32 %v373_v4, %v369_v2  ;;  %v381_v8 = vld [vmem:[#allocation2 + $0x10] sm:$0xff]  ;;  %v383_v9 = vld [vmem:[#allocation2 + $0x18] sm:$0xff]  ;;  %v56_v10 = vadd.f32 %v377_v6, %v375_v5  ;;  %vm137_vm2 = vcmask 1045504   ;;  %s331_s29 = smov [#allocation7]  }
  0x25   :  { %54 = vadd.xlane.f32.xlu1 %v53_v3  ;;  %v50_v11 = vadd.f32 %v383_v9, %v381_v8  ;;  %s221_s30 = sshll.u32 %s331_s29, 4  ;;  %s222_s30 = int_to_ptr.vmem [resolvable:$true] %s221_s30 }
  0x26   :  { %48 = vadd.xlane.f32.xlu0 %v47_v7  ;;  %s298_s3 = scalar_lea.vmem %s222_s30, 1024  ;;  %p303_p0 = scmp.lt.s32.totalorder %s222_s30, %s222_s30 }
  0x27   :  { %p299_p13 = scmp.ne.s32.totalorder %s222_s30, %s298_s3  ;;  %p304_p1 = scmp.lt.s32.totalorder %s298_s3, %s298_s3 }
  0x28   :  { %v91_v19 = vstv %s234_s0  ;;  %v124_v25 = vstv %s235_s27 }
  0x29   :  { %57 = vadd.xlane.f32.xlu1 %v56_v10  ;;  %v85_v36 = vstv %s84_s28  ;;  %p305_p2 = por %p304_p1, %p303_p0 }
  0x2a   :  { %51 = vadd.xlane.f32.xlu0 %v50_v11 }
  0x2b   :  { %p306_p3 = pnand %p305_p2, %p299_p13 }
  0xb2   :  { %v55_v13 = vpop.xlane.xlu1 %54 }
  0xb3   :  { %v61_v14 = vmul.f32 0.00390625, %v55_v13  ;;  %v49_v15 = vpop.xlane.xlu0 %48 }
  0xb4   :  { %v59_v16 = vmul.f32 0.00390625, %v49_v15 }
  0xb5   :  { %v71_v17 = vrot.slane %v61_v14, 7 }
  0xb6   :  { %v58_v18 = vpop.xlane.xlu1 %57  ;;  %v68_v21 = vrot.slane %v59_v16, 7 }
  0xb7   :  { %v81_v20 = vsel %vm67_vm0, 0.0, %v71_v17  ;;  %v62_v22 = vmul.f32 0.00390625, %v58_v18  ;;  %v52_v23 = vpop.xlane.xlu0 %51 }
  0xb8   :  { %v95_v24 = vmul.f32 %v91_v19, %v81_v20  ;;  %v128_v27 = vmul.f32 %v124_v25, %v81_v20  ;;  %v60_v28 = vmul.f32 0.00390625, %v52_v23  ;;  %v80_v29 = vsel %vm67_vm0, 0.0, %v68_v21 }
  0xb9   :  { %v72_v26 = vrot.slane %v62_v22, 7  ;;  %v88_v42 = vmul.f32 %v85_v36, %v81_v20  ;;  %v92_v43 = vmul.f32 %v91_v19, %v80_v29  ;;  %v86_v46 = vmul.f32 %v85_v36, %v80_v29 }
  0xba   :  { %v110_v32 = vrot.slane %v95_v24, 1  ;;  %v69_v37 = vrot.slane %v60_v28, 7  ;;  %v143_v38 = vrot.slane %v128_v27, 2  ;;  %v125_v49 = vmul.f32 %v124_v25, %v80_v29 }
  0xbb   :  { %v73_v30 = vsel %vm67_vm0, %v71_v17, %v72_v26  ;;  %v83_v31 = vsel %vm67_vm0, %v72_v26, 0.0  ;;  %v105_v57 = vrot.slane %v92_v43, 1 }
  0xbc   :  { %v96_v33 = vmul.f32 %v91_v19, %v73_v30  ;;  %v97_v34 = vmul.f32 %v91_v19, %v83_v31  ;;  %v129_v35 = vmul.f32 %v124_v25, %v73_v30  ;;  %v70_v44 = vsel %vm67_vm0, %v68_v21, %v69_v37 }
  0xbd   :  { %v82_v45 = vsel %vm67_vm0, %v69_v37, 0.0  ;;  %v130_v48 = vmul.f32 %v124_v25, %v83_v31  ;;  %v93_v52 = vmul.f32 %v91_v19, %v70_v44  ;;  %v126_v55 = vmul.f32 %v124_v25, %v70_v44 }
  0xbe   :  { %v111_v39 = vrot.slane %v96_v33, 1  ;;  %v113_v40 = vrot.slane %v97_v34, 1  ;;  %v144_v41 = vrot.slane %v129_v35, 2  ;;  %v94_v54 = vmul.f32 %v91_v19, %v82_v45 }
  0xbf   :  { %v127_v56 = vmul.f32 %v124_v25, %v82_v45  ;;  %v89_v58 = vmul.f32 %v85_v36, %v73_v30  ;;  %v106_v60 = vrot.slane %v93_v52, 1  ;;  %v146_v61 = vrot.slane %v130_v48, 2 }
  0xc0   :  { %v112_v47 = vsel %vm104_vm1, %v110_v32, %v111_v39  ;;  %v114_v50 = vsel %vm104_vm1, %v111_v39, %v113_v40  ;;  %v145_v53 = vsel %vm137_vm2, %v143_v38, %v144_v41  ;;  %v108_v62 = vrot.slane %v94_v54, 1 }
  0xc1   :  { %v121_v51 = vadd.f32 %v112_v47, %v88_v42  ;;  %v139_v63 = vrot.slane %v126_v55, 2  ;;  %v141_v3 = vrot.slane %v127_v56, 2  ;;  %v138_v7 = vrot.slane %v125_v49, 2 }
  0xc2   :  { %v122_v10 = vadd.f32 %v114_v50, %v89_v58  ;;  %v87_v11 = vmul.f32 %v85_v36, %v70_v44  ;;  %v107_v12 = vsel %vm104_vm1, %v105_v57, %v106_v60  ;;  %v109_v13 = vsel %vm104_vm1, %v106_v60, %v108_v62 }
  0xc3   :  { %v154_v59 = vadd.f32 %v145_v53, %v121_v51  ;;  %v119_v14 = vadd.f32 %v107_v12, %v86_v46  ;;  %v140_v17 = vsel %vm137_vm2, %v138_v7, %v139_v63  ;;  %v147_v18 = vsel %vm137_vm2, %v144_v41, %v146_v61 }
  0xc4   :  { %v120_v16 = vadd.f32 %v109_v13, %v87_v11  ;;  %v142_v19 = vsel %vm137_vm2, %v139_v63, %v141_v3  ;;  %v155_v21 = vadd.f32 %v147_v18, %v122_v10 }
  0xc5   :  { %v238_v15 = vmul.f32 -1.442695, %v154_v59  ;;  %v152_v20 = vadd.f32 %v140_v17, %v119_v14 }
  0xc6   :  { %v153_v22 = vadd.f32 %v142_v19, %v120_v16  ;;  %v239_v25 = vmul.f32 -1.442695, %v155_v21 }
  0xc7   :  { %v236_v23 = vmul.f32 -1.442695, %v152_v20  ;;  %248 = vpow2.f32 %v238_v15 }
  0xc8   :  { %v237_v24 = vmul.f32 -1.442695, %v153_v22 }
  0xc9   :  { %250 = vpow2.f32 %v236_v23 }
  0xca   :  { %252 = vpow2.f32 %v237_v24 }
  0xcb   :  { %254 = vpow2.f32 %v239_v25 }
  0xd1   :  { %v249_v26 = vpop.eup %248 }
  0xd2   :  { %v170_v31 = vadd.f32 1.0, %v249_v26 }
  0xd3   :  { %v251_v27 = vpop.eup %250 }
  0xd4   :  { %v253_v28 = vpop.eup %252  ;;  %v168_v29 = vadd.f32 1.0, %v251_v27 }
  0xd5   :  { %v169_v30 = vadd.f32 1.0, %v253_v28  ;;  %v255_v32 = vpop.eup %254 }
  0xd6   :  { %256 = vrcp.f32 %v168_v29  ;;  %v171_v33 = vadd.f32 1.0, %v255_v32 }
  0xd7   :  { %258 = vrcp.f32 %v169_v30 }
  0xd8   :  { %260 = vrcp.f32 %v170_v31 }
  0xd9   :  { %262 = vrcp.f32 %v171_v33 }
  0xe0   :  { %v257_v34 = vpop.eup %256 }
  0xe1   :  { %v259_v35 = vpop.eup %258  ;;  %182 = vperm.xlu0 %246, %v257_v34  }
  0xe2   :  { %187 = vperm.xlu1 %247, %v259_v35   ;;  %v261_v36 = vpop.eup %260 }
  0xe3   :  { %v263_v37 = vpop.eup %262 }
  0xe6   :  { %192 = vperm.xlu1 %247, %v261_v36  }
  0xea   :  { %197 = vperm.xlu1 %247, %v263_v37  }
 0x160   :  { %v183_v38 = vpop.permute.xlu0 %182 }
 0x161   :  { %v200_v39 = vmul.f32 %v183_v38, %v369_v2  ;;  %v201_v40 = vmul.f32 %v183_v38, %v373_v4  ;;  %v188_v41 = vpop.permute.xlu1 %187 }
 0x162   :  { %v202_v42 = vmul.f32 %v188_v41, %v381_v8  ;;  %v203_v43 = vmul.f32 %v188_v41, %v383_v9 }
 0x163   :  { %208 = vst [vmem:[#allocation7] sm:$0xff] %v200_v39  ;;  %209 = vst [vmem:[#allocation7 + $0x8] sm:$0xff] %v201_v40 }
 0x164   :  { %210 = vst [vmem:[#allocation7 + $0x10] sm:$0xff] %v202_v42  ;;  %211 = vst [vmem:[#allocation7 + $0x18] sm:$0xff] %v203_v43 }
 0x165   :  { %v193_v44 = vpop.permute.xlu1 %192 }
 0x166   :  { %v204_v45 = vmul.f32 %v193_v44, %v365_v0  ;;  %v205_v46 = vmul.f32 %v193_v44, %v367_v1 }
 0x168   :  { %212 = vst [vmem:[#allocation7 + $0x20] sm:$0xff] %v204_v45  ;;  %213 = vst [vmem:[#allocation7 + $0x28] sm:$0xff] %v205_v46 }
 0x169   :  { %v198_v2 = vpop.permute.xlu1 %197 }
 0x16a   :  { %v206_v4 = vmul.f32 %v198_v2, %v375_v5  ;;  %v207_v8 = vmul.f32 %v198_v2, %v377_v6 }
 0x16c   :  { %214 = vst [vmem:[#allocation7 + $0x30] sm:$0xff] %v206_v4  ;;  %215 = vst [vmem:[#allocation7 + $0x38] sm:$0xff] %v207_v8 }
 0x16d   :  { %309 = shalt.err (!%p306_p3)
}
 0x16e   :  { %s310_s6 = scalar_lea.hbm %s428_s2, 1024 }
 0x16f   :  { %p311_p4 = scmp.ne.s32.totalorder %s428_s2, %s310_s6  ;;  %p314_p5 = scmp.lt.u32.totalorder %s310_s6, %s428_s2 }
 0x171   :  { %p316_p6 = pnand %p314_p5, %p311_p4 }
 0x173   :  { %319 = shalt.err (!%p316_p6)
}
 0x174   :  { %227 = dma.vmem_to_hbm [thread:$0]  %s222_s30, 1024, %s428_s2, [#allocation4], %s327_s1, %s327_s1, %s328_s22  }
 0x175   :  { %324 = dma.done.wait [#allocation4], 1024  }
 0x176   :  { %325 = vsyncadd [#allocation4], 4294966272 }
 0x177   :  { %231 = vsyncpa [#allocation3], 1 }
 0x178   :  { %232 = vsyncpa [#allocation4], 1 }
 0x179   :  { %233 = vsyncpa [#allocation5], 1 }

</bundles_post_ra>
